<compile_context>
chip_gen: v7x
topology: tpu7x:2x2x1
jax: 0.10.0
libtpu: 0.0.40
codegen_flags: <defaults>
</compile_context>

<pallas_src>
import jax
import jax.numpy as jnp
from jax import lax
from jax.experimental import pallas as pl
from jax.experimental.pallas import tpu as pltpu

_LANES = 128


def _round_up(n, m):
    return ((n + m - 1) // m) * m


def _make_kernel(bb, S, E, E_pad, F_pad, H, d, use_blockdiag):
    rows = bb * S

    def kernel(x_ref, weT_ref, be_ref, wl_ref, bl_ref, g_ref, woT_ref, bo_ref,
               o_ref):
        # x_ref: (rows, F_pad) bf16 -- block_b batches already flattened along rows.
        x2 = x_ref[...]

        # ---- embed: Linear(F -> E); bf16 MXU operands, f32 accumulation ----
        y2 = jnp.dot(x2, weT_ref[...],
                     preferred_element_type=jnp.float32) + be_ref[...]

        # ---- local_mlp: per-head Linear(F//H -> F//H), shared across heads ----
        yb = y2.astype(jnp.bfloat16)
        if use_blockdiag:
            # small E: one lane-dense block-diagonal (E_pad, E_pad) matmul.
            z2 = jnp.dot(yb, wl_ref[...],
                         preferred_element_type=jnp.float32) + bl_ref[...]
        else:
            # large E / head-dim: real per-head (d, d) matmuls, no zero MACs.
            parts = [
                jnp.dot(yb[:, h * d:(h + 1) * d], wl_ref[...],
                        preferred_element_type=jnp.float32)
                for h in range(H)
            ]
            if E_pad > E:
                parts.append(jnp.zeros((rows, E_pad - E), jnp.float32))
            z2 = jnp.concatenate(parts, axis=1) + bl_ref[...]

        # ---- sequence mixing: einsum('bihf,oi->bohf', z, G) == G @ z per batch
        z3 = z2.reshape(bb, S, E_pad).astype(jnp.bfloat16)
        gb = jnp.broadcast_to(g_ref[...], (bb, S, S))
        m3 = lax.dot_general(gb, z3,
                             dimension_numbers=(((2,), (1,)), ((0,), (0,))),
                             preferred_element_type=jnp.float32)

        # ---- out_project: Linear(F -> F) ----
        m2 = m3.reshape(rows, E_pad).astype(jnp.bfloat16)
        out = jnp.dot(m2, woT_ref[...],
                      preferred_element_type=jnp.float32) + bo_ref[...]
        o_ref[...] = out.astype(o_ref.dtype)

    return kernel


def baseline_mixer_attention_heads(x, params, heads, *, block_b=None):
    """x: (B, S, F) float32. params: torch-layout weights (see reference)."""
    B, S, F = x.shape
    we, be = params["embed_w"], params["embed_b"]          # (E, F), (E,)
    wl, bl = params["local_w"], params["local_b"]          # (F//H, F//H), (F//H,)
    g = params["global_w"]                                 # (S, S)
    wo, bo = params["out_w"], params["out_b"]              # (F, F), (F,)
    E = we.shape[0]
    H = heads
    d = F // H
    if E != F:
        raise ValueError("module forward requires embed_dim == features")

    F_pad = _round_up(F, _LANES)
    E_pad = _round_up(E, _LANES)

    # local_mlp representation: block-diag is fine while it stays ~one MXU tile
    # (or when the head dim is lane-sparse anyway); otherwise head-batched path
    # avoids H-fold zero MACs and an O(E^2) mostly-zero VMEM weight.
    use_blockdiag = (E <= 256) or (d < 128)

    # batch blocking: pack block_b*S rows per grid step.  Keep rows a multiple
    # of 16 so the bf16 input block tiles cleanly (unless the block spans B).
    if block_b is None:
        divs = [dd for dd in range(1, B + 1) if B % dd == 0]
        ok = [dd for dd in divs if (dd * S) % 16 == 0 or dd == B]
        block_b = next((dd for dd in ok if dd * S >= 256), ok[-1])
        # TODO(synk): on v7x prefer B // block_b >= 2 so both TensorCores get
        # grid steps once B is large enough to allow that without starving rows.
    assert B % block_b == 0
    grid = (B // block_b,)
    rows = block_b * S

    cdt = jnp.bfloat16   # MXU operand dtype; accumulation / bias adds stay f32

    # ---- wrapper-side prep: transpose, pad to lane multiples, cast ----------
    x_p = jnp.pad(x, ((0, 0), (0, 0), (0, F_pad - F))).astype(cdt)
    x_p = x_p.reshape(B * S, F_pad)
    weT = jnp.pad(we.T, ((0, F_pad - F), (0, E_pad - E))).astype(cdt)
    be2 = jnp.pad(be, (0, E_pad - E)).reshape(1, E_pad).astype(jnp.float32)
    if use_blockdiag:
        wl_k = jnp.kron(jnp.eye(H, dtype=wl.dtype), wl.T)            # (E, E)
        wl_k = jnp.pad(wl_k, ((0, E_pad - E), (0, E_pad - E))).astype(cdt)
    else:
        wl_k = wl.T.astype(cdt)                                      # (d, d)
    bl2 = jnp.pad(jnp.tile(bl, H), (0, E_pad - E)).reshape(1, E_pad)
    bl2 = bl2.astype(jnp.float32)
    g_c = g.astype(cdt)
    woT = jnp.pad(wo.T, ((0, E_pad - E), (0, F_pad - F))).astype(cdt)
    bo2 = jnp.pad(bo, (0, F_pad - F)).reshape(1, F_pad).astype(jnp.float32)

    full = lambda a: pl.BlockSpec(a.shape, lambda b: (0,) * a.ndim)

    kernel = _make_kernel(block_b, S, E, E_pad, F_pad, H, d, use_blockdiag)

    # advisory cost estimate + explicit VMEM budget.
    local_macs = E_pad * E_pad if use_blockdiag else E * d
    flops = 2 * B * S * (F_pad * E_pad + local_macs + S * E_pad + E_pad * F_pad)
    weight_bytes = sum(int(a.size) * a.dtype.itemsize
                       for a in (weT, be2, wl_k, bl2, g_c, woT, bo2))
    io_bytes = (int(x_p.size) * x_p.dtype.itemsize
                + B * S * F_pad * x.dtype.itemsize)
    blk_bytes = (2 * weight_bytes                       # double-buffered weights
                 + 2 * rows * F_pad * 2                 # x block (bf16) x2 bufs
                 + 2 * rows * F_pad * x.dtype.itemsize  # out block x2 bufs
                 + 8 * rows * max(E_pad, F_pad) * 4)    # f32 intermediates
    vmem_limit = int(min(100 * 2**20, max(32 * 2**20, 2 * blk_bytes)))
    # TODO(synk): single-buffer the grid-invariant weight inputs with
    # pipeline_mode=pl.Buffered(1) for v7x VMEM headroom at large E/F; at these
    # shapes default double-buffering fits comfortably.

    out2 = pl.pallas_call(
        kernel,
        out_shape=jax.ShapeDtypeStruct((B * S, F_pad), x.dtype),
        grid_spec=pltpu.PrefetchScalarGridSpec(
            num_scalar_prefetch=0,
            grid=grid,
            in_specs=[
                pl.BlockSpec((rows, F_pad), lambda b: (b, 0)),   # x row slab
                full(weT), full(be2), full(wl_k), full(bl2),
                full(g_c), full(woT), full(bo2),
            ],
            out_specs=pl.BlockSpec((rows, F_pad), lambda b: (b, 0)),
        ),
        compiler_params=pltpu.CompilerParams(
            dimension_semantics=("parallel",),
            vmem_limit_bytes=vmem_limit),
        cost_estimate=pl.CostEstimate(
            flops=int(flops), transcendentals=0,
            bytes_accessed=int(weight_bytes + io_bytes)),
    )(x_p, weT, be2, wl_k, bl2, g_c, woT, bo2)

    return out2.reshape(B, S, F_pad)[..., :F]


def reference(x, params, heads):
    """Pure-JAX f32 reference following the PyTorch forward literally."""
    B, S, F = x.shape
    we, be = params["embed_w"], params["embed_b"]
    wl, bl = params["local_w"], params["local_b"]
    g = params["global_w"]
    wo, bo = params["out_w"], params["out_b"]
    H = heads

    y = jnp.einsum("bsf,ef->bse", x, we) + be                      # embed
    y = y.reshape(B, S, H, -1)
    z = jnp.einsum("bshd,od->bsho", y, wl) + bl                    # local_mlp
    m = jnp.einsum("bihf,oi->bohf", z, g)                          # global mixing
    out = jnp.einsum("bse,fe->bsf", m.reshape(B, S, -1), wo) + bo  # out_project
    return out


if __name__ == "__main__":
    # Small shapes consistent with the module (embed_dim must equal features
    # for the PyTorch forward to be shape-consistent).
    B, S, F, H = 2, 8, 32, 4
    E = F  # embed_dim

    key = jax.random.PRNGKey(0)
    keys = jax.random.split(key, 10)
    params = {
        "embed_w": jax.random.normal(keys[0], (E, F), jnp.float32) * 0.1,
        "embed_b": jax.random.normal(keys[1], (E,), jnp.float32) * 0.1,
        "local_w": jax.random.normal(keys[2], (F // H, F // H), jnp.float32) * 0.1,
        "local_b": jax.random.normal(keys[3], (F // H,), jnp.float32) * 0.1,
        "global_w": jax.random.uniform(keys[4], (S, S), jnp.float32),
        "out_w": jax.random.normal(keys[5], (F, F), jnp.float32) * 0.1,
        "out_b": jax.random.normal(keys[6], (F,), jnp.float32) * 0.1,
    }
    x = jax.random.normal(keys[7], (B, S, F), jnp.float32)

    out = baseline_mixer_attention_heads(x, params, heads=H)
    out = jax.block_until_ready(out)

    ref = reference(x, params, heads=H)
    assert out.shape == (B, S, F)
    # bf16 MXU operands (f32 accumulation) -> tolerance loosened vs pure f32.
    max_err = float(jnp.max(jnp.abs(out - ref)))
    assert jnp.allclose(out, ref, atol=5e-2, rtol=5e-2), (
        f"max abs err = {max_err}")

    print("KERNEL_OK")
</pallas_src>

<mosaic_0001>
module attributes {stable_mosaic.version = 11 : i64} {
  func.func @kernel(%arg0: i32, %arg1: memref<16x128xbf16, #tpu.memory_space<vmem>>, %arg2: memref<128x128xbf16, #tpu.memory_space<vmem>>, %arg3: memref<1x128xf32, #tpu.memory_space<vmem>>, %arg4: memref<128x128xbf16, #tpu.memory_space<vmem>>, %arg5: memref<1x128xf32, #tpu.memory_space<vmem>>, %arg6: memref<8x8xbf16, #tpu.memory_space<vmem>>, %arg7: memref<128x128xbf16, #tpu.memory_space<vmem>>, %arg8: memref<1x128xf32, #tpu.memory_space<vmem>>, %arg9: memref<16x128xf32, #tpu.memory_space<vmem>>) attributes {dimension_semantics = [#tpu.dimension_semantics<parallel>], iteration_bounds = array<i64: 1>, scalar_prefetch = 0 : i64, scratch_operands = 0 : i64, tpu.core_type = #tpu.core_type<tc>, window_params = [{transform_indices = @transform_0, window_bounds = array<i64: 16, 128>}, {pipeline_mode = #tpu.pipeline_mode<synchronous>, transform_indices = @transform_1, window_bounds = array<i64: 128, 128>}, {pipeline_mode = #tpu.pipeline_mode<synchronous>, transform_indices = @transform_2, window_bounds = array<i64: 1, 128>}, {pipeline_mode = #tpu.pipeline_mode<synchronous>, transform_indices = @transform_3, window_bounds = array<i64: 128, 128>}, {pipeline_mode = #tpu.pipeline_mode<synchronous>, transform_indices = @transform_4, window_bounds = array<i64: 1, 128>}, {pipeline_mode = #tpu.pipeline_mode<synchronous>, transform_indices = @transform_5, window_bounds = array<i64: 8, 8>}, {pipeline_mode = #tpu.pipeline_mode<synchronous>, transform_indices = @transform_6, window_bounds = array<i64: 128, 128>}, {pipeline_mode = #tpu.pipeline_mode<synchronous>, transform_indices = @transform_7, window_bounds = array<i64: 1, 128>}, {transform_indices = @transform_8, window_bounds = array<i64: 16, 128>}]} {
    %c0 = arith.constant 0 : index
    %c0_0 = arith.constant 0 : index
    %0 = vector.load %arg1[%c0, %c0_0] : memref<16x128xbf16, #tpu.memory_space<vmem>>, vector<16x128xbf16>
    %c0_1 = arith.constant 0 : index
    %c0_2 = arith.constant 0 : index
    %1 = vector.load %arg2[%c0_1, %c0_2] : memref<128x128xbf16, #tpu.memory_space<vmem>>, vector<128x128xbf16>
    %cst = arith.constant dense<0.000000e+00> : vector<16x128xf32>
    %2 = tpu.matmul %0, %1, %cst {dimension_numbers = #tpu.dot_dimension_numbers<[1], [0], [0], [1], [0, 0, 1, 1], [], []>} : vector<16x128xbf16>, vector<128x128xbf16>, vector<16x128xf32> -> vector<16x128xf32>
    %c0_3 = arith.constant 0 : index
    %c0_4 = arith.constant 0 : index
    %3 = vector.load %arg3[%c0_3, %c0_4] : memref<1x128xf32, #tpu.memory_space<vmem>>, vector<1x128xf32>
    %4 = vector.broadcast %3 : vector<1x128xf32> to vector<16x128xf32>
    %5 = arith.addf %2, %4 : vector<16x128xf32>
    %6 = arith.truncf %5 : vector<16x128xf32> to vector<16x128xbf16>
    %c0_5 = arith.constant 0 : index
    %c0_6 = arith.constant 0 : index
    %7 = vector.load %arg4[%c0_5, %c0_6] : memref<128x128xbf16, #tpu.memory_space<vmem>>, vector<128x128xbf16>
    %cst_7 = arith.constant dense<0.000000e+00> : vector<16x128xf32>
    %8 = tpu.matmul %6, %7, %cst_7 {dimension_numbers = #tpu.dot_dimension_numbers<[1], [0], [0], [1], [0, 0, 1, 1], [], []>} : vector<16x128xbf16>, vector<128x128xbf16>, vector<16x128xf32> -> vector<16x128xf32>
    %c0_8 = arith.constant 0 : index
    %c0_9 = arith.constant 0 : index
    %9 = vector.load %arg5[%c0_8, %c0_9] : memref<1x128xf32, #tpu.memory_space<vmem>>, vector<1x128xf32>
    %10 = vector.broadcast %9 : vector<1x128xf32> to vector<16x128xf32>
    %11 = arith.addf %8, %10 : vector<16x128xf32>
    %12 = vector.shape_cast %11 : vector<16x128xf32> to vector<2x8x128xf32>
    %13 = arith.truncf %12 : vector<2x8x128xf32> to vector<2x8x128xbf16>
    %c0_10 = arith.constant 0 : index
    %c0_11 = arith.constant 0 : index
    %14 = vector.load %arg6[%c0_10, %c0_11] : memref<8x8xbf16, #tpu.memory_space<vmem>>, vector<8x8xbf16>
    %15 = vector.shape_cast %14 : vector<8x8xbf16> to vector<1x8x8xbf16>
    %16 = vector.broadcast %15 : vector<1x8x8xbf16> to vector<2x8x8xbf16>
    %cst_12 = arith.constant dense<0.000000e+00> : vector<2x8x128xf32>
    %17 = tpu.matmul %16, %13, %cst_12 {dimension_numbers = #tpu.dot_dimension_numbers<[2], [1], [1], [2], [0, 0, 0, 1, 1, 2], [0], [0]>} : vector<2x8x8xbf16>, vector<2x8x128xbf16>, vector<2x8x128xf32> -> vector<2x8x128xf32>
    %18 = vector.shape_cast %17 : vector<2x8x128xf32> to vector<16x128xf32>
    %19 = arith.truncf %18 : vector<16x128xf32> to vector<16x128xbf16>
    %c0_13 = arith.constant 0 : index
    %c0_14 = arith.constant 0 : index
    %20 = vector.load %arg7[%c0_13, %c0_14] : memref<128x128xbf16, #tpu.memory_space<vmem>>, vector<128x128xbf16>
    %cst_15 = arith.constant dense<0.000000e+00> : vector<16x128xf32>
    %21 = tpu.matmul %19, %20, %cst_15 {dimension_numbers = #tpu.dot_dimension_numbers<[1], [0], [0], [1], [0, 0, 1, 1], [], []>} : vector<16x128xbf16>, vector<128x128xbf16>, vector<16x128xf32> -> vector<16x128xf32>
    %c0_16 = arith.constant 0 : index
    %c0_17 = arith.constant 0 : index
    %22 = vector.load %arg8[%c0_16, %c0_17] : memref<1x128xf32, #tpu.memory_space<vmem>>, vector<1x128xf32>
    %23 = vector.broadcast %22 : vector<1x128xf32> to vector<16x128xf32>
    %24 = arith.addf %21, %23 : vector<16x128xf32>
    %c0_18 = arith.constant 0 : index
    %c0_19 = arith.constant 0 : index
    %25 = vector.load %arg9[%c0_18, %c0_19] : memref<16x128xf32, #tpu.memory_space<vmem>>, vector<16x128xf32>
    tpu.vector_store %arg9[%c0_18, %c0_19], %24 {strides = array<i32>} : memref<16x128xf32, #tpu.memory_space<vmem>>, vector<16x128xf32>,
    return
  }
  func.func @transform_0(%arg0: i32) -> (i32, i32) {
    %c0_i32 = arith.constant 0 : i32
    %c0_i32_0 = arith.constant 0 : i32
    return %arg0, %c0_i32 : i32, i32
  }
  func.func @transform_1(%arg0: i32) -> (i32, i32) {
    %c0_i32 = arith.constant 0 : i32
    %c0_i32_0 = arith.constant 0 : i32
    %c0_i32_1 = arith.constant 0 : i32
    return %c0_i32, %c0_i32_0 : i32, i32
  }
  func.func @transform_2(%arg0: i32) -> (i32, i32) {
    %c0_i32 = arith.constant 0 : i32
    %c0_i32_0 = arith.constant 0 : i32
    %c0_i32_1 = arith.constant 0 : i32
    return %c0_i32, %c0_i32_0 : i32, i32
  }
  func.func @transform_3(%arg0: i32) -> (i32, i32) {
    %c0_i32 = arith.constant 0 : i32
    %c0_i32_0 = arith.constant 0 : i32
    %c0_i32_1 = arith.constant 0 : i32
    return %c0_i32, %c0_i32_0 : i32, i32
  }
  func.func @transform_4(%arg0: i32) -> (i32, i32) {
    %c0_i32 = arith.constant 0 : i32
    %c0_i32_0 = arith.constant 0 : i32
    %c0_i32_1 = arith.constant 0 : i32
    return %c0_i32, %c0_i32_0 : i32, i32
  }
  func.func @transform_5(%arg0: i32) -> (i32, i32) {
    %c0_i32 = arith.constant 0 : i32
    %c0_i32_0 = arith.constant 0 : i32
    %c0_i32_1 = arith.constant 0 : i32
    return %c0_i32, %c0_i32_0 : i32, i32
  }
  func.func @transform_6(%arg0: i32) -> (i32, i32) {
    %c0_i32 = arith.constant 0 : i32
    %c0_i32_0 = arith.constant 0 : i32
    %c0_i32_1 = arith.constant 0 : i32
    return %c0_i32, %c0_i32_0 : i32, i32
  }
  func.func @transform_7(%arg0: i32) -> (i32, i32) {
    %c0_i32 = arith.constant 0 : i32
    %c0_i32_0 = arith.constant 0 : i32
    %c0_i32_1 = arith.constant 0 : i32
    return %c0_i32, %c0_i32_0 : i32, i32
  }
  func.func @transform_8(%arg0: i32) -> (i32, i32) {
    %c0_i32 = arith.constant 0 : i32
    %c0_i32_0 = arith.constant 0 : i32
    return %arg0, %c0_i32 : i32, i32
  }
}

</mosaic_0001>

<bundles_post_ra>
// kernel: tpu_custom_call.1
= control target key start
LH: loop header
LB: loop body
LE: loop exit
PB: predicated region body
PF: predicated region fallthrough
CT: control target
= control target key end

     0   :  { %13 = vsyncpa [#allocation3], 0  ;;  %s1024_s0 = inlined_call_operand.hbm [shape: bf16[16,128], index: 0, kind: input, shape index: {}]   ;;  %s1025_s1 = inlined_call_operand.hbm [shape: bf16[128,128], index: 1, kind: input, shape index: {}]   ;;  %s1026_s2 = inlined_call_operand.vmem [shape: f32[1,128], index: 2, kind: input, shape index: {}]   ;;  %s1027_s3 = inlined_call_operand.hbm [shape: bf16[128,128], index: 3, kind: input, shape index: {}]   ;;  %s1028_s4 = inlined_call_operand.vmem [shape: f32[1,128], index: 4, kind: input, shape index: {}]   ;;  %s1029_s5 = inlined_call_operand.vmem [shape: bf16[8,8], index: 5, kind: input, shape index: {}]   ;;  %s1030_s6 = inlined_call_operand.hbm [shape: bf16[128,128], index: 6, kind: input, shape index: {}]   ;;  %s1031_s7 = inlined_call_operand.vmem [shape: f32[1,128], index: 7, kind: input, shape index: {}]   ;;  %s1032_s8 = inlined_call_operand.hbm [shape: f32[16,128], index: 8, kind: output, shape index: {}]  }
   0x1   :  { %14 = vsyncpa [#allocation6], 0 }
   0x2   :  { %15 = vsyncpa [#allocation9], 0 }
   0x3   :  { %16 = vsyncpa [#allocation4], 0  ;;  %s834_s27 = smov [#allocation5]   ;;  %s835_s29 = smov [#allocation2]  }
   0x4   :  { %s34_s28 = sshll.u32 %s834_s27, 4  ;;  %s22_s30 = sshll.u32 %s835_s29, 4  ;;  %s35_s28 = int_to_ptr.vmem [resolvable:$true] %s34_s28  ;;  %s890_s30 = int_to_ptr.vmem [resolvable:$true] %s22_s30 }
   0x5   :  { %s716_s11 = scalar_lea.hbm %s1025_s1, 1024 }
   0x6   :  { %p717_p0 = scmp.ne.s32.totalorder %s1025_s1, %s716_s11  ;;  %p720_p1 = scmp.lt.u32.totalorder %s716_s11, %s1025_s1 }
   0x8   :  { %p722_p2 = pnand %p720_p1, %p717_p0 }
   0xa   :  { %725 = shalt.err (!%p722_p2)
}
   0xb   :  { %s726_s16 = scalar_lea.vmem %s35_s28, 1024  ;;  %p731_p4 = scmp.lt.s32.totalorder %s35_s28, %s35_s28 }
   0xc   :  { %p727_p3 = scmp.ne.s32.totalorder %s35_s28, %s726_s16  ;;  %p732_p5 = scmp.lt.s32.totalorder %s726_s16, %s726_s16 }
   0xe   :  { %p733_p6 = por %p732_p5, %p731_p4 }
  0x10   :  { %p734_p7 = pnand %p733_p6, %p727_p3 }
  0x12   :  { %737 = shalt.err (!%p734_p7)
}
  0x13   :  { %s836_s17 = smov 64   ;;  %s837_s18 = smov 4  }
  0x14   :  { %40 = dma.hbm_to_vmem [thread:$0]  %s1025_s1, 1024, %s35_s28, [#allocation6], %s836_s17, %s836_s17, %s837_s18  }
  0x15   :  { %s738_s23 = scalar_lea.hbm %s1024_s0, 128 }
  0x16   :  { %p739_p8 = scmp.ne.s32.totalorder %s1024_s0, %s738_s23  ;;  %p742_p9 = scmp.lt.u32.totalorder %s738_s23, %s1024_s0 }
  0x18   :  { %p744_p10 = pnand %p742_p9, %p739_p8 }
  0x1a   :  { %747 = shalt.err (!%p744_p10)
}
  0x1b   :  { %s748_s29 = scalar_lea.vmem %s890_s30, 128  ;;  %p753_p12 = scmp.lt.s32.totalorder %s890_s30, %s890_s30 }
  0x1c   :  { %p749_p11 = scmp.ne.s32.totalorder %s890_s30, %s748_s29  ;;  %p754_p13 = scmp.lt.s32.totalorder %s748_s29, %s748_s29 }
  0x1e   :  { %p755_p0 = por %p754_p13, %p753_p12 }
  0x20   :  { %p756_p1 = pnand %p755_p0, %p749_p11 }
  0x22   :  { %759 = shalt.err (!%p756_p1)
}
  0x23   :  { %28 = dma.hbm_to_vmem [thread:$0]  %s1024_s0, 128, %s890_s30, [#allocation3], %s836_s17, %s836_s17, %s837_s18  }
  0x24   :  { %s838_s9 = smov [#allocation7]   ;;  %s839_s11 = smov [#allocation8]  }
  0x25   :  { %s48_s10 = sshll.u32 %s838_s9, 4  ;;  %s64_s12 = sshll.u32 %s839_s11, 4  ;;  %s49_s10 = int_to_ptr.vmem [resolvable:$true] %s48_s10  ;;  %s927_s12 = int_to_ptr.vmem [resolvable:$true] %s64_s12 }
  0x26   :  { %s760_s15 = scalar_lea.hbm %s1027_s3, 1024 }
  0x27   :  { %p761_p2 = scmp.ne.s32.totalorder %s1027_s3, %s760_s15  ;;  %p764_p3 = scmp.lt.u32.totalorder %s760_s15, %s1027_s3 }
  0x29   :  { %p766_p4 = pnand %p764_p3, %p761_p2 }
  0x2b   :  { %769 = shalt.err (!%p766_p4)
}
  0x2c   :  { %s770_s0 = scalar_lea.vmem %s49_s10, 1024  ;;  %p775_p6 = scmp.lt.s32.totalorder %s49_s10, %s49_s10 }
  0x2d   :  { %p771_p5 = scmp.ne.s32.totalorder %s49_s10, %s770_s0  ;;  %p776_p7 = scmp.lt.s32.totalorder %s770_s0, %s770_s0 }
  0x2f   :  { %p777_p8 = por %p776_p7, %p775_p6 }
  0x31   :  { %p778_p9 = pnand %p777_p8, %p771_p5 }
  0x33   :  { %781 = shalt.err (!%p778_p9)
}
  0x34   :  { %54 = dma.hbm_to_vmem [thread:$0]  %s1027_s3, 1024, %s49_s10, [#allocation6], %s836_s17, %s836_s17, %s837_s18  }
  0x35   :  { %s782_s25 = scalar_lea.hbm %s1030_s6, 1024 }
  0x36   :  { %p783_p10 = scmp.ne.s32.totalorder %s1030_s6, %s782_s25  ;;  %p786_p11 = scmp.lt.u32.totalorder %s782_s25, %s1030_s6 }
  0x38   :  { %p788_p12 = pnand %p786_p11, %p783_p10 }
  0x3a   :  { %791 = shalt.err (!%p788_p12)
}
  0x3b   :  { %s792_s28 = scalar_lea.vmem %s927_s12, 1024  ;;  %p797_p0 = scmp.lt.s32.totalorder %s927_s12, %s927_s12 }
  0x3c   :  { %p793_p13 = scmp.ne.s32.totalorder %s927_s12, %s792_s28  ;;  %p798_p1 = scmp.lt.s32.totalorder %s792_s28, %s792_s28 }
  0x3e   :  { %p799_p2 = por %p798_p1, %p797_p0 }
  0x40   :  { %p800_p3 = pnand %p799_p2, %p793_p13 }
  0x42   :  { %803 = shalt.err (!%p800_p3)
}
  0x43   :  { %70 = dma.hbm_to_vmem [thread:$0]  %s1030_s6, 1024, %s927_s12, [#allocation9], %s836_s17, %s836_s17, %s837_s18  }
  0x44   :  { %826 = dma.done.wait [#allocation3], 128  }
  0x45   :  { %827 = vsyncadd [#allocation3], 4294967168 }
  0x46   :  { %828 = dma.done.wait [#allocation6], 2048  }
  0x47   :  { %829 = vsyncadd [#allocation6], 4294965248 }
  0x48   :  { %830 = dma.done.wait [#allocation9], 1024  }
  0x49   :  { %831 = vsyncadd [#allocation9], 4294966272  ;;  %v840_v0 = vmov 0.0   ;;  %vm841_vm0 = vmmov 0   ;;  %v691_v1 = vld [vmem:[#allocation5] sm:$0xff]   ;;  %v692_v2 = vld [vmem:[#allocation5 + $0x8] sm:$0xff]  }
  0x4a   :  { %608 = vmatprep.subr.bf16.mxu0 %v840_v0  ;;  %624 = vmatprep.mubr.msk.bf16.mxu0 %vm841_vm0, %v840_v0  ;;  %v693_v3 = vld [vmem:[#allocation5 + $0x10] sm:$0xff]   ;;  %v700_v4 = vld [vmem:[#allocation7] sm:$0xff]   ;;  %v694_v5 = vld [vmem:[#allocation5 + $0x18] sm:$0xff]   ;;  %vm326_vm1 = vcmask 1043456   ;;  %vm322_vm2 = vcmask 64512   ;;  %s842_s12 = smov [#allocation10]  }
  0x4b   :  { %628 = vmatprep.subr.bf16.mxu1 %v840_v0  ;;  %644 = vmatprep.mubr.msk.bf16.mxu1 %vm841_vm0, %v840_v0  ;;  %v701_v6 = vld [vmem:[#allocation7 + $0x8] sm:$0xff]   ;;  %v695_v7 = vld [vmem:[#allocation5 + $0x20] sm:$0xff]   ;;  %v702_v8 = vld [vmem:[#allocation7 + $0x10] sm:$0xff]   ;;  %s533_s13 = sshll.u32 %s842_s12, 4  ;;  %s534_s13 = int_to_ptr.vmem [resolvable:$true] %s533_s13 }
  0x4c   :  { %609 = vmatpush3.bf16.msra.mxu0 %v691_v1  ;;  %629 = vmatpush3.bf16.msra.mxu1 %v700_v4  ;;  %v696_v9 = vld [vmem:[#allocation5 + $0x28] sm:$0xff]   ;;  %v703_v10 = vld [vmem:[#allocation7 + $0x18] sm:$0xff]   ;;  %v697_v11 = vld [vmem:[#allocation5 + $0x30] sm:$0xff]   ;;  %s804_s14 = scalar_lea.vmem %s534_s13, 256  ;;  %p809_p5 = scmp.lt.s32.totalorder %s534_s13, %s534_s13 }
  0x4d   :  { %610 = vmatprep.subr.bf16.mxu0 %v840_v0  ;;  %630 = vmatprep.subr.bf16.mxu1 %v840_v0  ;;  %v704_v12 = vld [vmem:[#allocation7 + $0x20] sm:$0xff]   ;;  %v698_v13 = vld [vmem:[#allocation5 + $0x38] sm:$0xff]   ;;  %v705_v14 = vld [vmem:[#allocation7 + $0x28] sm:$0xff]   ;;  %p805_p4 = scmp.ne.s32.totalorder %s534_s13, %s804_s14  ;;  %p810_p6 = scmp.lt.s32.totalorder %s804_s14, %s804_s14 }
  0x4e   :  { %v699_v15 = vld [vmem:[#allocation2] sm:$0xff]   ;;  %v706_v16 = vld [vmem:[#allocation7 + $0x30] sm:$0xff]   ;;  %v708_v26 = vld [vmem:[#allocation8] sm:$0xff]  }
  0x4f   :  { %v707_v17 = vld [vmem:[#allocation7 + $0x38] sm:$0xff]   ;;  %v709_v27 = vld [vmem:[#allocation8 + $0x8] sm:$0xff]   ;;  %v710_v28 = vld [vmem:[#allocation8 + $0x10] sm:$0xff]   ;;  %p811_p7 = por %p810_p6, %p809_p5 }
  0x50   :  { %611 = vmatpush3.bf16.msra.mxu0 %v692_v2  ;;  %631 = vmatpush3.bf16.msra.mxu1 %v701_v6  ;;  %v547_v18 = vld [vmem:[%s1026_s2] ss:$0 sm:$0xff]  ;;  %v712_v30 = vld [vmem:[#allocation8 + $0x20] sm:$0xff]   ;;  %v713_v31 = vld [vmem:[#allocation8 + $0x28] sm:$0xff]  }
  0x51   :  { %612 = vmatprep.subr.bf16.mxu0 %v840_v0  ;;  %632 = vmatprep.subr.bf16.mxu1 %v840_v0  ;;  %v711_v29 = vld [vmem:[#allocation8 + $0x18] sm:$0xff]   ;;  %v714_v44 = vld [vmem:[#allocation8 + $0x30] sm:$0xff]   ;;  %p812_p8 = pnand %p811_p7, %p805_p4 }
  0x52   :  { %v557_v32 = vld [vmem:[%s1028_s4] ss:$0 sm:$0xff] }
  0x53   :  { %v321_v42 = vld [vmem:[%s1029_s5] sm:$0xf] }
  0x54   :  { %613 = vmatpush3.bf16.msra.mxu0 %v693_v3  ;;  %633 = vmatpush3.bf16.msra.mxu1 %v702_v8  ;;  %v715_v45 = vld [vmem:[#allocation8 + $0x38] sm:$0xff]  }
  0x55   :  { %614 = vmatprep.subr.bf16.mxu0 %v840_v0  ;;  %634 = vmatprep.subr.bf16.mxu1 %v840_v0  ;;  %v568_v55 = vld [vmem:[%s1031_s7] ss:$0 sm:$0xff] }
  0x58   :  { %615 = vmatpush3.bf16.msra.mxu0 %v694_v5  ;;  %635 = vmatpush3.bf16.msra.mxu1 %v703_v10 }
  0x59   :  { %616 = vmatprep.subr.bf16.mxu0 %v840_v0  ;;  %636 = vmatprep.subr.bf16.mxu1 %v840_v0 }
  0x5c   :  { %617 = vmatpush3.bf16.msra.mxu0 %v695_v7  ;;  %637 = vmatpush3.bf16.msra.mxu1 %v704_v12 }
  0x5d   :  { %618 = vmatprep.subr.bf16.mxu0 %v840_v0  ;;  %638 = vmatprep.subr.bf16.mxu1 %v840_v0 }
  0x60   :  { %619 = vmatpush3.bf16.msra.mxu0 %v696_v9  ;;  %639 = vmatpush3.bf16.msra.mxu1 %v705_v14 }
  0x61   :  { %620 = vmatprep.subr.bf16.mxu0 %v840_v0  ;;  %640 = vmatprep.subr.bf16.mxu1 %v840_v0 }
  0x64   :  { %621 = vmatpush3.bf16.msra.mxu0 %v697_v11  ;;  %641 = vmatpush3.bf16.msra.mxu1 %v706_v16 }
  0x65   :  { %622 = vmatprep.subr.bf16.mxu0 %v840_v0  ;;  %642 = vmatprep.subr.bf16.mxu1 %v840_v0 }
  0x68   :  { %623 = vmatpush3.bf16.msra.mxu0 %v698_v13  ;;  %643 = vmatpush3.bf16.msra.mxu1 %v707_v17 }
  0x69   :  { %660 = vmatprep.subr.bf16.mxu0 %v840_v0  ;;  %648 = vmatprep.subr.bf16.mxu1 %v840_v0 }
  0x6b   :  { %625 = vmatmul.mubr.bf16.vlgmr.msra.gmra.mrb[0].mxu0 %v699_v15 }
  0x6c   :  { %676 = vmatprep.mubr.msk.bf16.mxu0 %vm841_vm0, %v840_v0  ;;  %661 = vmatpush3.bf16.msra.mxu0 %v708_v26 }
  0x6d   :  { %662 = vmatprep.subr.bf16.mxu0 %v840_v0 }
  0x70   :  { %663 = vmatpush3.bf16.msra.mxu0 %v709_v27 }
  0x71   :  { %664 = vmatprep.subr.bf16.mxu0 %v840_v0 }
  0x74   :  { %665 = vmatpush3.bf16.msra.mxu0 %v710_v28 }
  0x75   :  { %666 = vmatprep.subr.bf16.mxu0 %v840_v0 }
  0x78   :  { %667 = vmatpush3.bf16.msra.mxu0 %v711_v29 }
  0x79   :  { %668 = vmatprep.subr.bf16.mxu0 %v840_v0 }
  0x7c   :  { %669 = vmatpush3.bf16.msra.mxu0 %v712_v30 }
  0x7d   :  { %670 = vmatprep.subr.bf16.mxu0 %v840_v0 }
  0x80   :  { %671 = vmatpush3.bf16.msra.mxu0 %v713_v31 }
  0x81   :  { %672 = vmatprep.subr.bf16.mxu0 %v840_v0 }
  0x84   :  { %673 = vmatpush3.bf16.msra.mxu0 %v714_v44 }
  0x85   :  { %674 = vmatprep.subr.bf16.mxu0 %v840_v0 }
  0x88   :  { %675 = vmatpush3.bf16.msra.mxu0 %v715_v45 }
 0x13e   :  { %v199_v19 = vpop.f32.mrb[0].mxu0 }
 0x13f   :  { %v626_v20 = vpop.f32.mrb[1].mxu0  ;;  %v200_v22 = vadd.f32 %v547_v18, %v199_v19 }
 0x140   :  { %v202_v21 = vpop.f32.mrb[2].mxu0 }
 0x141   :  { %v203_v23 = vadd.f32 %v547_v18, %v202_v21  ;;  %v627_v24 = vpop.f32.mrb[3].mxu0 }
 0x143   :  { %v206_v25 = vpack.c.bf16 %v203_v23, %v200_v22 }
 0x145   :  { %645 = vmatmul.mubr.bf16.vlgmr.msra.gmra.mrb[0].mxu1 %v206_v25 }
 0x146   :  { %650 = vmatprep.mubr.msk.bf16.mxu1 %vm841_vm0, %v840_v0 }
 0x218   :  { %v312_v33 = vpop.f32.mrb[0].mxu1 }
 0x219   :  { %v313_v34 = vadd.f32 %v557_v32, %v312_v33  ;;  %v646_v35 = vpop.f32.mrb[1].mxu1 }
 0x21a   :  { %v315_v36 = vpop.f32.mrb[2].mxu1 }
 0x21b   :  { %v319_v37 = vpack.c.bf16 %v313_v34, %v313_v34  ;;  %v316_v38 = vadd.f32 %v557_v32, %v315_v36  ;;  %v647_v39 = vpop.f32.mrb[3].mxu1 }
 0x21d   :  { %v328_v40 = vsel %vm326_vm1, %v319_v37, 0  ;;  %v320_v41 = vpack.c.bf16 %v316_v38, %v316_v38 }
 0x21e   :  { %649 = vmatpush3.bf16.msra.mxu1 %v328_v40 }
 0x21f   :  { %654 = vmatprep.subr.bf16.mxu1 %v840_v0  ;;  %v371_v43 = vsel %vm326_vm1, %v320_v41, 0 }
 0x221   :  { %651 = vmatmul.mubr.msk.bf16.vlgmr.msra.gmra.mrb[4].mxu1 %vm322_vm2, %v321_v42 }
 0x222   :  { %655 = vmatpush3.bf16.msra.mxu1 %v371_v43  ;;  %656 = vmatprep.mubr.msk.bf16.mxu1 %vm841_vm0, %v840_v0 }
 0x229   :  { %657 = vmatmul.mubr.msk.bf16.vlgmr.msra.gmra.mrb[8].mxu1 %vm322_vm2, %v321_v42 }
 0x2f4   :  { %v364_v46 = vpop.f32.mrb[4].mxu1 }
 0x2f5   :  { %v652_v47 = vpop.f32.mrb[5].mxu1 }
 0x2f6   :  { %v367_v48 = vpop.f32.mrb[6].mxu1 }
 0x2f7   :  { %v653_v49 = vpop.f32.mrb[7].mxu1 }
 0x2fc   :  { %v407_v50 = vpop.f32.mrb[8].mxu1 }
 0x2fd   :  { %v413_v51 = vpack.c.bf16 %v407_v50, %v364_v46  ;;  %v658_v52 = vpop.f32.mrb[9].mxu1 }
 0x2fe   :  { %v410_v53 = vpop.f32.mrb[10].mxu1 }
 0x2ff   :  { %677 = vmatmul.mubr.bf16.vlgmr.msra.gmra.mrb[4].mxu0 %v413_v51  ;;  %v659_v54 = vpop.f32.mrb[11].mxu1 }
 0x3d2   :  { %v519_v56 = vpop.f32.mrb[4].mxu0 }
 0x3d3   :  { %v520_v57 = vadd.f32 %v568_v55, %v519_v56  ;;  %v678_v58 = vpop.f32.mrb[5].mxu0 }
 0x3d4   :  { %v522_v59 = vpop.f32.mrb[6].mxu0 }
 0x3d5   :  { %526 = vst [vmem:[#allocation10] sm:$0xff] %v520_v57  ;;  %v523_v60 = vadd.f32 %v568_v55, %v522_v59  ;;  %v679_v61 = vpop.f32.mrb[7].mxu0 }
 0x3d7   :  { %527 = vst [vmem:[#allocation10 + $0x8] sm:$0xff] %v523_v60 }
 0x3d8   :  { %815 = shalt.err (!%p812_p8)
}
 0x3d9   :  { %s816_s16 = scalar_lea.hbm %s1032_s8, 256 }
 0x3da   :  { %p817_p9 = scmp.ne.s32.totalorder %s1032_s8, %s816_s16  ;;  %p820_p10 = scmp.lt.u32.totalorder %s816_s16, %s1032_s8 }
 0x3dc   :  { %p822_p11 = pnand %p820_p10, %p817_p9 }
 0x3de   :  { %825 = shalt.err (!%p822_p11)
}
 0x3df   :  { %s843_s30 = smov 128   ;;  %s844_s22 = smov 8  }
 0x3e0   :  { %539 = dma.vmem_to_hbm [thread:$0]  %s534_s13, 256, %s1032_s8, [#allocation4], %s843_s30, %s843_s30, %s844_s22  }
 0x3e1   :  { %832 = dma.done.wait [#allocation4], 256  }
 0x3e2   :  { %833 = vsyncadd [#allocation4], 4294967040 }
 0x3e3   :  { %543 = vsyncpa [#allocation3], 1 }
 0x3e4   :  { %544 = vsyncpa [#allocation6], 1 }
 0x3e5   :  { %545 = vsyncpa [#allocation9], 1 }
 0x3e6   :  { %546 = vsyncpa [#allocation4], 1 }

</bundles_post_ra>
